<compile_context>
chip_gen: v7x
topology: tpu7x:2x2x1
jax: 0.10.0
libtpu: 0.0.40
codegen_flags: <defaults>
</compile_context>

<pallas_src>
import math

import jax
import jax.numpy as jnp
from jax.experimental import pallas as pl
from jax.experimental.pallas import tpu as pltpu


def _drop_path_kernel(s_ref, x_ref, o_ref):
    # s_ref: (tm, 1) f32 per-row scale, value in {0, 1/keep_prob}.
    # x_ref / o_ref: (tm, 128) lane-dense tile of the flattened activations.
    o_ref[...] = x_ref[...] * s_ref[...].astype(x_ref.dtype)


def _choose_row_tile(rows, C, itemsize, max_block_bytes):
    """Largest legal row tile under the byte budget.

    Prefers a divisor of `rows` that is a multiple of 8 (no masked tail tile);
    otherwise returns the largest multiple of 8 under the budget.
    """
    cap = max(1, max_block_bytes // (C * itemsize))
    if cap >= rows:
        return rows
    if rows < 8:
        return rows
    # Search divisors of `rows` that are multiples of 8 and <= cap.
    best = 0
    d = 1
    while d * d <= rows:
        if rows % d == 0:
            for cand in (d, rows // d):
                if cand <= cap and cand % 8 == 0 and cand > best:
                    best = cand
        d += 1
    if best:
        return best
    tm = (cap // 8) * 8
    return tm if tm >= 8 else 8  # minimum legal (8, 128) tile; Pallas masks tails


def drop_path(x, drop_prob: float = 0.0, training: bool = False, *, key=None,
              _max_block_bytes: int = 4 << 20):
    """Pallas implementation of timm-style drop_path (stochastic depth)."""
    if drop_prob == 0.0 or not training:
        return x
    assert key is not None, "need a PRNG key when training with drop_prob > 0"

    keep_prob = 1.0 - drop_prob
    B = x.shape[0]
    F = math.prod(x.shape[1:]) if x.ndim > 1 else 1

    # Per-sample scale in f32: floor(keep_prob + U[0,1)) / keep_prob  (0 or 1/kp).
    u = jax.random.uniform(key, (B,), dtype=jnp.float32)
    scale = jnp.floor(jnp.float32(keep_prob) + u) / jnp.float32(keep_prob)

    if F % 128 != 0:
        # Ragged per-sample size: plain broadcast multiply (XLA fuses it); a
        # (.., F<128) Pallas block would force masked stores / unbounded VMEM.
        bshape = (B,) + (1,) * (x.ndim - 1)
        return x * scale.reshape(bshape).astype(x.dtype)

    C = 128
    R = F // C                      # rows per sample
    rows = B * R                    # total rows in the flattened 2-D view
    xv = x.reshape(rows, C)
    scale_rows = jnp.repeat(scale, R)[:, None]          # (rows, 1) f32

    itemsize = jnp.dtype(x.dtype).itemsize
    tm = _choose_row_tile(rows, C, itemsize, _max_block_bytes)
    block_bytes = tm * C * itemsize
    # in + out, double-buffered, plus headroom; capped for v7x (64 MiB physical).
    vmem_limit = int(min(48 << 20, max(16 << 20, 4 * block_bytes + (4 << 20))))

    out2d = pl.pallas_call(
        _drop_path_kernel,
        out_shape=jax.ShapeDtypeStruct((rows, C), x.dtype),
        grid=(pl.cdiv(rows, tm),),
        in_specs=[
            pl.BlockSpec((tm, 1), lambda i: (i, 0)),     # per-row scale column
            pl.BlockSpec((tm, C), lambda i: (i, 0)),     # activation tile
        ],
        out_specs=pl.BlockSpec((tm, C), lambda i: (i, 0)),
        compiler_params=pltpu.CompilerParams(
            dimension_semantics=("parallel",),
            vmem_limit_bytes=vmem_limit,
        ),
        cost_estimate=pl.CostEstimate(
            flops=rows * C,
            transcendentals=0,
            bytes_accessed=2 * rows * C * itemsize + rows * 4,
        ),
    )(scale_rows, xv)

    return out2d.reshape(x.shape)


class DropPath:
    """Mirror of the PyTorch DropPath module (forward only)."""

    def __init__(self, drop_prob=None):
        self.drop_prob = drop_prob
        self.training = True

    def __call__(self, x, *, key=None):
        return drop_path(
            x,
            self.drop_prob if self.drop_prob is not None else 0.0,
            self.training,
            key=key,
        )


if __name__ == "__main__":
    key = jax.random.PRNGKey(0)
    k_x, k_drop, k_x2, k_x3 = jax.random.split(key, 4)

    drop_prob = 0.3
    keep_prob = 1.0 - drop_prob

    # --- main check: small ViT-like token tensor (B, N, D), F % 128 == 0 ---
    B, N, D = 2, 8, 128
    x = jax.random.normal(k_x, (B, N, D), dtype=jnp.float32)

    module = DropPath(drop_prob=drop_prob)
    module.training = True
    out = jax.block_until_ready(module(x, key=k_drop))

    u = jax.random.uniform(k_drop, (B,), dtype=jnp.float32)
    mask = jnp.floor(keep_prob + u)[:, None, None]
    ref = x / keep_prob * mask
    assert jnp.allclose(out, ref, atol=1e-5, rtol=1e-5), "mismatch vs reference"

    # --- multi-tile path: tiny block budget so grid > 1 and a tile spans
    #     a sample boundary (validates the per-row scale stream) ---
    B3, N3, D3 = 2, 24, 128
    x3 = jax.random.normal(k_x3, (B3, N3, D3), dtype=jnp.float32)
    out3 = jax.block_until_ready(
        drop_path(x3, drop_prob, True, key=k_drop, _max_block_bytes=8 * 1024))
    u3 = jax.random.uniform(k_drop, (B3,), dtype=jnp.float32)
    mask3 = jnp.floor(keep_prob + u3)[:, None, None]
    ref3 = x3 / keep_prob * mask3
    assert jnp.allclose(out3, ref3, atol=1e-5, rtol=1e-5), "multi-tile mismatch"

    # --- bf16 path (native-dtype multiply, scale cast in-kernel) ---
    x_bf = x.astype(jnp.bfloat16)
    out_bf = jax.block_until_ready(drop_path(x_bf, drop_prob, True, key=k_drop))
    assert jnp.allclose(out_bf.astype(jnp.float32), ref, atol=2e-2, rtol=2e-2), \
        "bf16 mismatch"

    # --- fallback path: per-sample size not a multiple of 128 (plain jnp) ---
    B2, N2, D2 = 2, 5, 48
    x2 = jax.random.normal(k_x2, (B2, N2, D2), dtype=jnp.float32)
    out2 = jax.block_until_ready(drop_path(x2, drop_prob, True, key=k_drop))
    u2 = jax.random.uniform(k_drop, (B2,), dtype=jnp.float32)
    mask2 = jnp.floor(keep_prob + u2)[:, None, None]
    ref2 = x2 / keep_prob * mask2
    assert jnp.allclose(out2, ref2, atol=1e-5, rtol=1e-5), "fallback mismatch"

    # --- eval mode / drop_prob==0 must be identity ---
    module.training = False
    out_eval = jax.block_until_ready(module(x, key=k_drop))
    assert jnp.array_equal(out_eval, x)

    print("KERNEL_OK")
</pallas_src>

<mosaic_0001>
module attributes {stable_mosaic.version = 11 : i64} {
  func.func @_drop_path_kernel(%arg0: i32, %arg1: memref<16x1xf32, #tpu.memory_space<vmem>>, %arg2: memref<16x128xf32, #tpu.memory_space<vmem>>, %arg3: memref<16x128xf32, #tpu.memory_space<vmem>>) attributes {dimension_semantics = [#tpu.dimension_semantics<parallel>], iteration_bounds = array<i64: 1>, scalar_prefetch = 0 : i64, scratch_operands = 0 : i64, tpu.core_type = #tpu.core_type<tc>, window_params = [{transform_indices = @transform_0, window_bounds = array<i64: 16, 1>}, {transform_indices = @transform_1, window_bounds = array<i64: 16, 128>}, {transform_indices = @transform_2, window_bounds = array<i64: 16, 128>}]} {
    %c0 = arith.constant 0 : index
    %c0_0 = arith.constant 0 : index
    %0 = vector.load %arg2[%c0, %c0_0] : memref<16x128xf32, #tpu.memory_space<vmem>>, vector<16x128xf32>
    %c0_1 = arith.constant 0 : index
    %c0_2 = arith.constant 0 : index
    %1 = vector.load %arg1[%c0_1, %c0_2] : memref<16x1xf32, #tpu.memory_space<vmem>>, vector<16x1xf32>
    %2 = vector.broadcast %1 : vector<16x1xf32> to vector<16x128xf32>
    %3 = arith.mulf %0, %2 : vector<16x128xf32>
    %c0_3 = arith.constant 0 : index
    %c0_4 = arith.constant 0 : index
    %4 = vector.load %arg3[%c0_3, %c0_4] : memref<16x128xf32, #tpu.memory_space<vmem>>, vector<16x128xf32>
    tpu.vector_store %arg3[%c0_3, %c0_4], %3 {strides = array<i32>} : memref<16x128xf32, #tpu.memory_space<vmem>>, vector<16x128xf32>,
    return
  }
  func.func @transform_0(%arg0: i32) -> (i32, i32) {
    %c0_i32 = arith.constant 0 : i32
    %c0_i32_0 = arith.constant 0 : i32
    return %arg0, %c0_i32 : i32, i32
  }
  func.func @transform_1(%arg0: i32) -> (i32, i32) {
    %c0_i32 = arith.constant 0 : i32
    %c0_i32_0 = arith.constant 0 : i32
    return %arg0, %c0_i32 : i32, i32
  }
  func.func @transform_2(%arg0: i32) -> (i32, i32) {
    %c0_i32 = arith.constant 0 : i32
    %c0_i32_0 = arith.constant 0 : i32
    return %arg0, %c0_i32 : i32, i32
  }
}

</mosaic_0001>

<bundles_post_ra>
// kernel: tpu_custom_call.1
= control target key start
LH: loop header
LB: loop body
LE: loop exit
PB: predicated region body
PF: predicated region fallthrough
CT: control target
= control target key end

     0   :  { %s118_s0 = inlined_call_operand.vmem [shape: f32[16,1], index: 0, kind: input, shape index: {}]   ;;  %s119_s1 = inlined_call_operand.vmem [shape: f32[16,128], index: 1, kind: input, shape index: {}]   ;;  %s120_s2 = inlined_call_operand.hbm [shape: f32[16,128], index: 2, kind: output, shape index: {}]  }
   0x1   :  { %v14_v0 = vld [vmem:[%s118_s0] sm:$0xff] }
   0x2   :  { %7 = vsyncpa [#allocation3], 0  ;;  %v75_v1 = vmov 0   ;;  %v15_v2 = vld [vmem:[%s118_s0 + $0x8] sm:$0xff]  ;;  %v12_v3 = vld [vmem:[%s119_s1] sm:$0xff]  ;;  %s76_s15 = smov [#allocation2]  }
   0x3   :  { %50 = vset.pattern.permute.xlu0 %v75_v1  ;;  %s35_s16 = sshll.u32 %s76_s15, 4  ;;  %v13_v6 = vld [vmem:[%s119_s1 + $0x8] sm:$0xff]  ;;  %s36_s16 = int_to_ptr.vmem [resolvable:$true] %s35_s16 }
   0x4   :  { %18 = vperm.xlu0 %50, %v14_v0   ;;  %s51_s19 = scalar_lea.vmem %s36_s16, 256  ;;  %p56_p1 = scmp.lt.s32.totalorder %s36_s16, %s36_s16 }
   0x5   :  { %p52_p0 = scmp.ne.s32.totalorder %s36_s16, %s51_s19  ;;  %p57_p2 = scmp.lt.s32.totalorder %s51_s19, %s51_s19 }
   0x7   :  { %p58_p3 = por %p57_p2, %p56_p1 }
   0x8   :  { %23 = vperm.xlu0 %50, %v15_v2  }
   0x9   :  { %p59_p4 = pnand %p58_p3, %p52_p0 }
  0x83   :  { %v19_v4 = vpop.permute.xlu0 %18 }
  0x84   :  { %v26_v5 = vmul.f32 %v19_v4, %v12_v3 }
  0x86   :  { %28 = vst [vmem:[#allocation2] sm:$0xff] %v26_v5 }
  0x87   :  { %v24_v7 = vpop.permute.xlu0 %23 }
  0x88   :  { %v27_v8 = vmul.f32 %v24_v7, %v13_v6 }
  0x8a   :  { %29 = vst [vmem:[#allocation2 + $0x8] sm:$0xff] %v27_v8 }
  0x8b   :  { %62 = shalt.err (!%p59_p4)
}
  0x8c   :  { %s63_s21 = scalar_lea.hbm %s120_s2, 256 }
  0x8d   :  { %p64_p5 = scmp.ne.s32.totalorder %s120_s2, %s63_s21  ;;  %p67_p6 = scmp.lt.u32.totalorder %s63_s21, %s120_s2 }
  0x8f   :  { %p69_p7 = pnand %p67_p6, %p64_p5 }
  0x91   :  { %72 = shalt.err (!%p69_p7)
}
  0x92   :  { %s77_s25 = smov 128   ;;  %s78_s26 = smov 8  }
  0x93   :  { %41 = dma.vmem_to_hbm [thread:$0]  %s36_s16, 256, %s120_s2, [#allocation3], %s77_s25, %s77_s25, %s78_s26  }
  0x94   :  { %73 = dma.done.wait [#allocation3], 256  }
  0x95   :  { %74 = vsyncadd [#allocation3], 4294967040 }
  0x96   :  { %45 = vsyncpa [#allocation3], 1 }

</bundles_post_ra>
